<compile_context>
chip_gen: v7x
topology: tpu7x:2x2x1
jax: 0.10.0
libtpu: 0.0.40
codegen_flags: <defaults>
</compile_context>

<pallas_src>
import functools
import math

import jax
import jax.numpy as jnp
from jax.experimental import pallas as pl
from jax.experimental.pallas import tpu as pltpu


# ----------------------------------------------------------------------------
# Kernels
# ----------------------------------------------------------------------------

def _attention_kernel(x_ref, mask_ref, wqkv_ref, o_ref, *, H, D, E, scale):
    """One batch element per grid step: fused QKV projection, per-head masked
    softmax attention, output written lane-dense in concat-head layout."""
    x = x_ref[0]                                                      # (S, E)
    # Fused projection: W_qkv = [blockdiag(Wq.T) | blockdiag(Wk.T) | blockdiag(Wv.T)]
    qkv = jnp.dot(x, wqkv_ref[...], preferred_element_type=jnp.float32)   # (S, 3E)

    m = mask_ref[0]                                                   # (1, S) additive (0 / -1e30)

    outs = []
    for h in range(H):                                                # static unroll, H small
        qh = qkv[:, h * D:(h + 1) * D]                                # (S, D)
        kh = qkv[:, E + h * D:E + (h + 1) * D]                        # (S, D)
        vh = qkv[:, 2 * E + h * D:2 * E + (h + 1) * D]                # (S, D)

        # energy = q @ k^T without an explicit transpose (contract dim 1 of both)
        energy = jax.lax.dot_general(
            qh, kh, (((1,), (1,)), ((), ())),
            preferred_element_type=jnp.float32)                       # (S_q, S_k)

        # softmax(energy / sqrt(embedding_size) + additive_mask, axis=-1)
        scaled = energy * scale + m
        row_max = jnp.max(scaled, axis=-1, keepdims=True)
        e = jnp.exp(scaled - row_max)
        denom = jnp.sum(e, axis=-1, keepdims=True)
        att = e * pl.reciprocal(denom, approx=True)

        outs.append(jnp.dot(att, vh, preferred_element_type=jnp.float32))   # (S, D)

    # Single lane-dense store in final concat-head layout.
    o_ref[0] = jnp.concatenate(outs, axis=-1)                         # (S, E)


def _proj_res_ln_kernel(x_ref, res_ref, w_ref, b_ref, g_ref, beta_ref, o_ref, *, eps):
    """fc_out (Linear E->E, weight pre-transposed to (E_in, E_out)) + residual + LayerNorm."""
    x = x_ref[...]                                                    # (TM, E)
    y = jnp.dot(x, w_ref[...], preferred_element_type=jnp.float32) + b_ref[...]
    y = y + res_ref[...]
    mean = jnp.mean(y, axis=-1, keepdims=True)
    var = jnp.mean(jnp.square(y - mean), axis=-1, keepdims=True)
    yn = (y - mean) * jax.lax.rsqrt(var + eps)
    o_ref[...] = yn * g_ref[...] + beta_ref[...]


def _ffn_res_ln_kernel(x_ref, w1_ref, b1_ref, w2_ref, b2_ref,
                       g_ref, beta_ref, o_ref, *, eps):
    """FFN (Linear -> ReLU -> Linear, weights pre-transposed) + residual + LayerNorm."""
    x = x_ref[...]                                                    # (TM, E)
    h = jnp.dot(x, w1_ref[...], preferred_element_type=jnp.float32) + b1_ref[...]
    h = jnp.maximum(h, 0.0)
    y = jnp.dot(h, w2_ref[...], preferred_element_type=jnp.float32) + b2_ref[...]
    y = y + x
    mean = jnp.mean(y, axis=-1, keepdims=True)
    var = jnp.mean(jnp.square(y - mean), axis=-1, keepdims=True)
    yn = (y - mean) * jax.lax.rsqrt(var + eps)
    o_ref[...] = yn * g_ref[...] + beta_ref[...]


# ----------------------------------------------------------------------------
# Pallas-call wrappers
# ----------------------------------------------------------------------------

_VMEM_LIMIT = 32 * 1024 * 1024  # explicit cap; safe on v5e/v6e (128 MiB) and v7x (64 MiB)


def _row_tile(M):
    """Largest row tile (multiple of 8) that divides M and leaves >= 2 grid steps
    (so v7x can shard across its 2 TensorCores); capped for VMEM."""
    for tm in (512, 256, 128, 64, 32, 16, 8):
        if M % tm == 0 and M // tm >= 2:
            return tm
    return M


def multi_head_attention(x, mask_add, w_qkv, E, H):
    """x: (N, S, E); mask_add: (N, 1, S) additive float; w_qkv: (E, 3E).
    Returns (N, S, E) already in concat-head layout."""
    N, S, _ = x.shape
    D = E // H
    scale = 1.0 / math.sqrt(E)   # matches reference: softmax(energy / sqrt(embedding_size))
    kern = functools.partial(_attention_kernel, H=H, D=D, E=E, scale=scale)
    return pl.pallas_call(
        kern,
        out_shape=jax.ShapeDtypeStruct((N, S, E), jnp.float32),
        grid=(N,),
        in_specs=[
            pl.BlockSpec((1, S, E), lambda n: (n, 0, 0)),
            pl.BlockSpec((1, 1, S), lambda n: (n, 0, 0)),
            pl.BlockSpec((E, 3 * E), lambda n: (0, 0)),
        ],
        out_specs=pl.BlockSpec((1, S, E), lambda n: (n, 0, 0)),
        compiler_params=pltpu.CompilerParams(
            dimension_semantics=("parallel",),
            vmem_limit_bytes=_VMEM_LIMIT),
    )(x, mask_add, w_qkv)


def proj_res_ln(x2d, res2d, w_t, b, gamma, beta, eps=1e-5):
    M, E = x2d.shape
    TM = _row_tile(M)
    kern = functools.partial(_proj_res_ln_kernel, eps=eps)
    return pl.pallas_call(
        kern,
        out_shape=jax.ShapeDtypeStruct((M, E), jnp.float32),
        grid=(M // TM,),
        in_specs=[
            pl.BlockSpec((TM, E), lambda i: (i, 0)),
            pl.BlockSpec((TM, E), lambda i: (i, 0)),
            pl.BlockSpec((E, E), lambda i: (0, 0)),
            pl.BlockSpec((1, E), lambda i: (0, 0)),
            pl.BlockSpec((1, E), lambda i: (0, 0)),
            pl.BlockSpec((1, E), lambda i: (0, 0)),
        ],
        out_specs=pl.BlockSpec((TM, E), lambda i: (i, 0)),
        compiler_params=pltpu.CompilerParams(
            dimension_semantics=("parallel",),
            vmem_limit_bytes=_VMEM_LIMIT),
    )(x2d, res2d, w_t, b.reshape(1, -1), gamma.reshape(1, -1), beta.reshape(1, -1))


def ffn_res_ln(x2d, w1_t, b1, w2_t, b2, gamma, beta, eps=1e-5):
    M, E = x2d.shape
    hidden = w1_t.shape[1]
    TM = _row_tile(M)
    kern = functools.partial(_ffn_res_ln_kernel, eps=eps)
    return pl.pallas_call(
        kern,
        out_shape=jax.ShapeDtypeStruct((M, E), jnp.float32),
        grid=(M // TM,),
        in_specs=[
            pl.BlockSpec((TM, E), lambda i: (i, 0)),
            pl.BlockSpec((E, hidden), lambda i: (0, 0)),
            pl.BlockSpec((1, hidden), lambda i: (0, 0)),
            pl.BlockSpec((hidden, E), lambda i: (0, 0)),
            pl.BlockSpec((1, E), lambda i: (0, 0)),
            pl.BlockSpec((1, E), lambda i: (0, 0)),
            pl.BlockSpec((1, E), lambda i: (0, 0)),
        ],
        out_specs=pl.BlockSpec((TM, E), lambda i: (i, 0)),
        compiler_params=pltpu.CompilerParams(
            dimension_semantics=("parallel",),
            vmem_limit_bytes=_VMEM_LIMIT),
    )(x2d, w1_t, b1.reshape(1, -1), w2_t, b2.reshape(1, -1),
      gamma.reshape(1, -1), beta.reshape(1, -1))


# ----------------------------------------------------------------------------
# Encoder forward (glue)
# ----------------------------------------------------------------------------

def _fused_qkv_weight(wq, wk, wv, H):
    """Build (E, 3E) weight: [kron(I_H, Wq.T) | kron(I_H, Wk.T) | kron(I_H, Wv.T)]
    so x(S,E) @ W_qkv applies the shared per-head (D,D) projections to every head
    in a single matmul, with heads staying packed in lanes."""
    eye = jnp.eye(H, dtype=wq.dtype)
    return jnp.concatenate(
        [jnp.kron(eye, wq.T), jnp.kron(eye, wk.T), jnp.kron(eye, wv.T)], axis=1)


def encoder_forward(params, x_ids, mask):
    N, S = x_ids.shape
    E = params["word_emb"].shape[1]
    H = params["num_heads"]

    positions = jnp.arange(S)
    # word_embedding(x) + positional_embedding(positions); dropout = identity (eval)
    out = params["word_emb"][x_ids] + params["pos_emb"][positions][None, :, :]

    # Additive float mask (0 attend / -1e30 masked): one VPU add in-kernel, no -inf NaNs.
    mask_add = jnp.where(mask == 0, jnp.float32(-1e30), jnp.float32(0.0))   # (N, 1, S)

    for layer in params["layers"]:
        # --- SelfAttention (q = k = v = out); output already in concat-head layout ---
        w_qkv = _fused_qkv_weight(layer["wq"], layer["wk"], layer["wv"], H)  # (E, 3E)
        attn = multi_head_attention(out, mask_add, w_qkv, E, H)             # (N, S, E)

        # fc_out + residual(query) + LayerNorm1  (dropout = identity)
        res = out.reshape(N * S, E)
        x = proj_res_ln(attn.reshape(N * S, E), res,
                        layer["fc_w"].T, layer["fc_b"],
                        layer["ln1_g"], layer["ln1_b"])

        # FFN + residual + LayerNorm2  (dropout = identity)
        out2d = ffn_res_ln(x, layer["ff_w1"].T, layer["ff_b1"],
                           layer["ff_w2"].T, layer["ff_b2"],
                           layer["ln2_g"], layer["ln2_b"])
        out = out2d.reshape(N, S, E)

    return out


# ----------------------------------------------------------------------------
# Deterministic parameter init (PyTorch (out, in) weight convention)
# ----------------------------------------------------------------------------

def init_params(key, vocab, E, num_layers, H, forward_expansion, max_length):
    D = E // H
    hidden = forward_expansion * E
    keys = jax.random.split(key, 2 + num_layers)
    params = {
        "word_emb": 0.02 * jax.random.normal(keys[0], (vocab, E), jnp.float32),
        "pos_emb": 0.02 * jax.random.normal(keys[1], (max_length, E), jnp.float32),
        "num_heads": H,
        "layers": [],
    }
    for i in range(num_layers):
        lk = jax.random.split(keys[2 + i], 10)
        layer = {
            "wq": 0.1 * jax.random.normal(lk[0], (D, D), jnp.float32),
            "wk": 0.1 * jax.random.normal(lk[1], (D, D), jnp.float32),
            "wv": 0.1 * jax.random.normal(lk[2], (D, D), jnp.float32),
            "fc_w": 0.05 * jax.random.normal(lk[3], (E, E), jnp.float32),
            "fc_b": 0.01 * jax.random.normal(lk[4], (E,), jnp.float32),
            "ff_w1": 0.05 * jax.random.normal(lk[5], (hidden, E), jnp.float32),
            "ff_b1": 0.01 * jax.random.normal(lk[6], (hidden,), jnp.float32),
            "ff_w2": 0.05 * jax.random.normal(lk[7], (E, hidden), jnp.float32),
            "ff_b2": 0.01 * jax.random.normal(lk[8], (E,), jnp.float32),
            "ln1_g": jnp.ones((E,), jnp.float32),
            "ln1_b": jnp.zeros((E,), jnp.float32),
            "ln2_g": jnp.ones((E,), jnp.float32),
            "ln2_b": jnp.zeros((E,), jnp.float32),
        }
        params["layers"].append(layer)
    return params


# ----------------------------------------------------------------------------
# Main
# ----------------------------------------------------------------------------

if __name__ == "__main__":
    # Small config consistent with the module
    SRC_VOCAB = 50
    EMB = 32
    NUM_LAYERS = 2
    HEADS = 4
    FWD_EXP = 2
    MAX_LEN = 16
    N, S = 2, 8

    key = jax.random.PRNGKey(0)
    pkey, xkey = jax.random.split(key)
    params = init_params(pkey, SRC_VOCAB, EMB, NUM_LAYERS, HEADS, FWD_EXP, MAX_LEN)

    # token ids in [1, vocab); key-padding mask (N, 1, S), last two keys of batch 1 masked
    x_ids = jax.random.randint(xkey, (N, S), 1, SRC_VOCAB, dtype=jnp.int32)
    mask = jnp.ones((N, 1, S), dtype=jnp.int32)
    mask = mask.at[1, 0, 6:].set(0)

    out = encoder_forward(params, x_ids, mask)
    out = jax.block_until_ready(out)
    assert out.shape == (N, S, EMB) and out.dtype == jnp.float32
    assert bool(jnp.all(jnp.isfinite(out)))
    # TODO(synk): dropout is eval-mode identity; training-mode dropout (pltpu PRNG) not implemented.
    print("KERNEL_OK")
</pallas_src>

<mosaic_0001>
module attributes {stable_mosaic.version = 11 : i64} {
  func.func @_attention_kernel(%arg0: i32, %arg1: memref<1x8x32xf32, #tpu.memory_space<vmem>>, %arg2: memref<1x1x8xf32, #tpu.memory_space<vmem>>, %arg3: memref<32x96xf32, #tpu.memory_space<vmem>>, %arg4: memref<1x8x32xf32, #tpu.memory_space<vmem>>) attributes {dimension_semantics = [#tpu.dimension_semantics<parallel>], iteration_bounds = array<i64: 2>, scalar_prefetch = 0 : i64, scratch_operands = 0 : i64, tpu.core_type = #tpu.core_type<tc>, window_params = [{transform_indices = @transform_0, window_bounds = array<i64: 1, 8, 32>}, {transform_indices = @transform_1, window_bounds = array<i64: 1, 1, 8>}, {pipeline_mode = #tpu.pipeline_mode<synchronous>, transform_indices = @transform_2, window_bounds = array<i64: 32, 96>}, {transform_indices = @transform_3, window_bounds = array<i64: 1, 8, 32>}]} {
    %c0 = arith.constant 0 : index
    %c0_0 = arith.constant 0 : index
    %c0_1 = arith.constant 0 : index
    %0 = vector.load %arg1[%c0, %c0_0, %c0_1] : memref<1x8x32xf32, #tpu.memory_space<vmem>>, vector<1x8x32xf32>
    %1 = vector.shape_cast %0 : vector<1x8x32xf32> to vector<8x32xf32>
    %c0_2 = arith.constant 0 : index
    %c0_3 = arith.constant 0 : index
    %2 = vector.load %arg3[%c0_2, %c0_3] : memref<32x96xf32, #tpu.memory_space<vmem>>, vector<32x96xf32>
    %cst = arith.constant dense<0.000000e+00> : vector<8x96xf32>
    %3 = tpu.matmul %1, %2, %cst {dimension_numbers = #tpu.dot_dimension_numbers<[1], [0], [0], [1], [0, 0, 1, 1], [], []>} : vector<8x32xf32>, vector<32x96xf32>, vector<8x96xf32> -> vector<8x96xf32>
    %c0_4 = arith.constant 0 : index
    %c0_5 = arith.constant 0 : index
    %c0_6 = arith.constant 0 : index
    %4 = vector.load %arg2[%c0_4, %c0_5, %c0_6] : memref<1x1x8xf32, #tpu.memory_space<vmem>>, vector<1x1x8xf32>
    %5 = vector.shape_cast %4 : vector<1x1x8xf32> to vector<1x8xf32>
    %6 = vector.extract_strided_slice %3 {offsets = [0, 0], sizes = [8, 8], strides = [1, 1]} : vector<8x96xf32> to vector<8x8xf32>
    %7 = vector.extract_strided_slice %3 {offsets = [0, 32], sizes = [8, 8], strides = [1, 1]} : vector<8x96xf32> to vector<8x8xf32>
    %8 = vector.extract_strided_slice %3 {offsets = [0, 64], sizes = [8, 8], strides = [1, 1]} : vector<8x96xf32> to vector<8x8xf32>
    %cst_7 = arith.constant dense<0.000000e+00> : vector<8x8xf32>
    %9 = tpu.matmul %6, %7, %cst_7 {dimension_numbers = #tpu.dot_dimension_numbers<[1], [1], [0], [0], [0, 0, 1, 0], [], []>} : vector<8x8xf32>, vector<8x8xf32>, vector<8x8xf32> -> vector<8x8xf32>
    %cst_8 = arith.constant 0.176776692 : f32
    %10 = vector.broadcast %cst_8 : f32 to vector<8x8xf32>
    %11 = arith.mulf %9, %10 : vector<8x8xf32>
    %12 = vector.broadcast %5 : vector<1x8xf32> to vector<8x8xf32>
    %13 = arith.addf %11, %12 : vector<8x8xf32>
    %cst_9 = arith.constant dense<0xFF800000> : vector<8xf32>
    %14 = vector.multi_reduction <maximumf>, %13, %cst_9 [1] : vector<8x8xf32> to vector<8xf32>
    %15 = vector.shape_cast %14 : vector<8xf32> to vector<8x1xf32>
    %16 = vector.broadcast %15 : vector<8x1xf32> to vector<8x8xf32>
    %17 = arith.subf %13, %16 : vector<8x8xf32>
    %18 = math.exp %17 : vector<8x8xf32>
    %cst_10 = arith.constant dense<0.000000e+00> : vector<8xf32>
    %19 = vector.multi_reduction <add>, %18, %cst_10 [1] : vector<8x8xf32> to vector<8xf32>
    %20 = vector.shape_cast %19 : vector<8xf32> to vector<8x1xf32>
    %21 = tpu.reciprocal %20 {approx = true} : vector<8x1xf32> -> vector<8x1xf32>
    %22 = vector.broadcast %21 : vector<8x1xf32> to vector<8x8xf32>
    %23 = arith.mulf %18, %22 : vector<8x8xf32>
    %cst_11 = arith.constant dense<0.000000e+00> : vector<8x8xf32>
    %24 = tpu.matmul %23, %8, %cst_11 {dimension_numbers = #tpu.dot_dimension_numbers<[1], [0], [0], [1], [0, 0, 1, 1], [], []>} : vector<8x8xf32>, vector<8x8xf32>, vector<8x8xf32> -> vector<8x8xf32>
    %25 = vector.extract_strided_slice %3 {offsets = [0, 8], sizes = [8, 8], strides = [1, 1]} : vector<8x96xf32> to vector<8x8xf32>
    %26 = vector.extract_strided_slice %3 {offsets = [0, 40], sizes = [8, 8], strides = [1, 1]} : vector<8x96xf32> to vector<8x8xf32>
    %27 = vector.extract_strided_slice %3 {offsets = [0, 72], sizes = [8, 8], strides = [1, 1]} : vector<8x96xf32> to vector<8x8xf32>
    %cst_12 = arith.constant dense<0.000000e+00> : vector<8x8xf32>
    %28 = tpu.matmul %25, %26, %cst_12 {dimension_numbers = #tpu.dot_dimension_numbers<[1], [1], [0], [0], [0, 0, 1, 0], [], []>} : vector<8x8xf32>, vector<8x8xf32>, vector<8x8xf32> -> vector<8x8xf32>
    %cst_13 = arith.constant 0.176776692 : f32
    %29 = vector.broadcast %cst_13 : f32 to vector<8x8xf32>
    %30 = arith.mulf %28, %29 : vector<8x8xf32>
    %31 = vector.broadcast %5 : vector<1x8xf32> to vector<8x8xf32>
    %32 = arith.addf %30, %31 : vector<8x8xf32>
    %cst_14 = arith.constant dense<0xFF800000> : vector<8xf32>
    %33 = vector.multi_reduction <maximumf>, %32, %cst_14 [1] : vector<8x8xf32> to vector<8xf32>
    %34 = vector.shape_cast %33 : vector<8xf32> to vector<8x1xf32>
    %35 = vector.broadcast %34 : vector<8x1xf32> to vector<8x8xf32>
    %36 = arith.subf %32, %35 : vector<8x8xf32>
    %37 = math.exp %36 : vector<8x8xf32>
    %cst_15 = arith.constant dense<0.000000e+00> : vector<8xf32>
    %38 = vector.multi_reduction <add>, %37, %cst_15 [1] : vector<8x8xf32> to vector<8xf32>
    %39 = vector.shape_cast %38 : vector<8xf32> to vector<8x1xf32>
    %40 = tpu.reciprocal %39 {approx = true} : vector<8x1xf32> -> vector<8x1xf32>
    %41 = vector.broadcast %40 : vector<8x1xf32> to vector<8x8xf32>
    %42 = arith.mulf %37, %41 : vector<8x8xf32>
    %cst_16 = arith.constant dense<0.000000e+00> : vector<8x8xf32>
    %43 = tpu.matmul %42, %27, %cst_16 {dimension_numbers = #tpu.dot_dimension_numbers<[1], [0], [0], [1], [0, 0, 1, 1], [], []>} : vector<8x8xf32>, vector<8x8xf32>, vector<8x8xf32> -> vector<8x8xf32>
    %44 = vector.extract_strided_slice %3 {offsets = [0, 16], sizes = [8, 8], strides = [1, 1]} : vector<8x96xf32> to vector<8x8xf32>
    %45 = vector.extract_strided_slice %3 {offsets = [0, 48], sizes = [8, 8], strides = [1, 1]} : vector<8x96xf32> to vector<8x8xf32>
    %46 = vector.extract_strided_slice %3 {offsets = [0, 80], sizes = [8, 8], strides = [1, 1]} : vector<8x96xf32> to vector<8x8xf32>
    %cst_17 = arith.constant dense<0.000000e+00> : vector<8x8xf32>
    %47 = tpu.matmul %44, %45, %cst_17 {dimension_numbers = #tpu.dot_dimension_numbers<[1], [1], [0], [0], [0, 0, 1, 0], [], []>} : vector<8x8xf32>, vector<8x8xf32>, vector<8x8xf32> -> vector<8x8xf32>
    %cst_18 = arith.constant 0.176776692 : f32
    %48 = vector.broadcast %cst_18 : f32 to vector<8x8xf32>
    %49 = arith.mulf %47, %48 : vector<8x8xf32>
    %50 = vector.broadcast %5 : vector<1x8xf32> to vector<8x8xf32>
    %51 = arith.addf %49, %50 : vector<8x8xf32>
    %cst_19 = arith.constant dense<0xFF800000> : vector<8xf32>
    %52 = vector.multi_reduction <maximumf>, %51, %cst_19 [1] : vector<8x8xf32> to vector<8xf32>
    %53 = vector.shape_cast %52 : vector<8xf32> to vector<8x1xf32>
    %54 = vector.broadcast %53 : vector<8x1xf32> to vector<8x8xf32>
    %55 = arith.subf %51, %54 : vector<8x8xf32>
    %56 = math.exp %55 : vector<8x8xf32>
    %cst_20 = arith.constant dense<0.000000e+00> : vector<8xf32>
    %57 = vector.multi_reduction <add>, %56, %cst_20 [1] : vector<8x8xf32> to vector<8xf32>
    %58 = vector.shape_cast %57 : vector<8xf32> to vector<8x1xf32>
    %59 = tpu.reciprocal %58 {approx = true} : vector<8x1xf32> -> vector<8x1xf32>
    %60 = vector.broadcast %59 : vector<8x1xf32> to vector<8x8xf32>
    %61 = arith.mulf %56, %60 : vector<8x8xf32>
    %cst_21 = arith.constant dense<0.000000e+00> : vector<8x8xf32>
    %62 = tpu.matmul %61, %46, %cst_21 {dimension_numbers = #tpu.dot_dimension_numbers<[1], [0], [0], [1], [0, 0, 1, 1], [], []>} : vector<8x8xf32>, vector<8x8xf32>, vector<8x8xf32> -> vector<8x8xf32>
    %63 = vector.extract_strided_slice %3 {offsets = [0, 24], sizes = [8, 8], strides = [1, 1]} : vector<8x96xf32> to vector<8x8xf32>
    %64 = vector.extract_strided_slice %3 {offsets = [0, 56], sizes = [8, 8], strides = [1, 1]} : vector<8x96xf32> to vector<8x8xf32>
    %65 = vector.extract_strided_slice %3 {offsets = [0, 88], sizes = [8, 8], strides = [1, 1]} : vector<8x96xf32> to vector<8x8xf32>
    %cst_22 = arith.constant dense<0.000000e+00> : vector<8x8xf32>
    %66 = tpu.matmul %63, %64, %cst_22 {dimension_numbers = #tpu.dot_dimension_numbers<[1], [1], [0], [0], [0, 0, 1, 0], [], []>} : vector<8x8xf32>, vector<8x8xf32>, vector<8x8xf32> -> vector<8x8xf32>
    %cst_23 = arith.constant 0.176776692 : f32
    %67 = vector.broadcast %cst_23 : f32 to vector<8x8xf32>
    %68 = arith.mulf %66, %67 : vector<8x8xf32>
    %69 = vector.broadcast %5 : vector<1x8xf32> to vector<8x8xf32>
    %70 = arith.addf %68, %69 : vector<8x8xf32>
    %cst_24 = arith.constant dense<0xFF800000> : vector<8xf32>
    %71 = vector.multi_reduction <maximumf>, %70, %cst_24 [1] : vector<8x8xf32> to vector<8xf32>
    %72 = vector.shape_cast %71 : vector<8xf32> to vector<8x1xf32>
    %73 = vector.broadcast %72 : vector<8x1xf32> to vector<8x8xf32>
    %74 = arith.subf %70, %73 : vector<8x8xf32>
    %75 = math.exp %74 : vector<8x8xf32>
    %cst_25 = arith.constant dense<0.000000e+00> : vector<8xf32>
    %76 = vector.multi_reduction <add>, %75, %cst_25 [1] : vector<8x8xf32> to vector<8xf32>
    %77 = vector.shape_cast %76 : vector<8xf32> to vector<8x1xf32>
    %78 = tpu.reciprocal %77 {approx = true} : vector<8x1xf32> -> vector<8x1xf32>
    %79 = vector.broadcast %78 : vector<8x1xf32> to vector<8x8xf32>
    %80 = arith.mulf %75, %79 : vector<8x8xf32>
    %cst_26 = arith.constant dense<0.000000e+00> : vector<8x8xf32>
    %81 = tpu.matmul %80, %65, %cst_26 {dimension_numbers = #tpu.dot_dimension_numbers<[1], [0], [0], [1], [0, 0, 1, 1], [], []>} : vector<8x8xf32>, vector<8x8xf32>, vector<8x8xf32> -> vector<8x8xf32>
    %82 = tpu.concatenate %24, %43, %62, %81 in 1 : vector<8x8xf32>, vector<8x8xf32>, vector<8x8xf32>, vector<8x8xf32> -> vector<8x32xf32>
    %c0_27 = arith.constant 0 : index
    %c0_28 = arith.constant 0 : index
    %c0_29 = arith.constant 0 : index
    %83 = vector.load %arg4[%c0_27, %c0_28, %c0_29] : memref<1x8x32xf32, #tpu.memory_space<vmem>>, vector<1x8x32xf32>
    %84 = vector.shape_cast %83 : vector<1x8x32xf32> to vector<8x32xf32>
    %85 = vector.shape_cast %82 : vector<8x32xf32> to vector<1x8x32xf32>
    tpu.vector_store %arg4[%c0_27, %c0_28, %c0_29], %85 {strides = array<i32>} : memref<1x8x32xf32, #tpu.memory_space<vmem>>, vector<1x8x32xf32>,
    return
  }
  func.func @transform_0(%arg0: i32) -> (i32, i32, i32) {
    %c0_i32 = arith.constant 0 : i32
    %c0_i32_0 = arith.constant 0 : i32
    %c0_i32_1 = arith.constant 0 : i32
    return %arg0, %c0_i32, %c0_i32_0 : i32, i32, i32
  }
  func.func @transform_1(%arg0: i32) -> (i32, i32, i32) {
    %c0_i32 = arith.constant 0 : i32
    %c0_i32_0 = arith.constant 0 : i32
    %c0_i32_1 = arith.constant 0 : i32
    return %arg0, %c0_i32, %c0_i32_0 : i32, i32, i32
  }
  func.func @transform_2(%arg0: i32) -> (i32, i32) {
    %c0_i32 = arith.constant 0 : i32
    %c0_i32_0 = arith.constant 0 : i32
    %c0_i32_1 = arith.constant 0 : i32
    return %c0_i32, %c0_i32_0 : i32, i32
  }
  func.func @transform_3(%arg0: i32) -> (i32, i32, i32) {
    %c0_i32 = arith.constant 0 : i32
    %c0_i32_0 = arith.constant 0 : i32
    %c0_i32_1 = arith.constant 0 : i32
    return %arg0, %c0_i32, %c0_i32_0 : i32, i32, i32
  }
}

</mosaic_0001>

<bundles_post_ra>
// kernel: tpu_custom_call.1
= control target key start
LH: loop header
LB: loop body
LE: loop exit
PB: predicated region body
PF: predicated region fallthrough
CT: control target
= control target key end

     0   :  { %8 = vsyncpa [#allocation3], 0  ;;  %s1728_s0 = inlined_call_operand.hbm [shape: f32[2,8,32], index: 0, kind: input, shape index: {}]   ;;  %s1729_s1 = inlined_call_operand.vmem [shape: f32[2,1,8], index: 1, kind: input, shape index: {}]   ;;  %s1730_s2 = inlined_call_operand.hbm [shape: f32[32,96], index: 2, kind: input, shape index: {}]   ;;  %s1731_s3 = inlined_call_operand.hbm [shape: f32[2,8,32], index: 3, kind: output, shape index: {}]  }
   0x1   :  { %10 = vsyncpa [#allocation3 + $0x1], 0 }
   0x2   :  { %11 = vsyncpa [#allocation6], 0 }
   0x3   :  { %12 = vsyncpa [#allocation4], 0 }
   0x4   :  { %14 = vsyncpa [#allocation4 + $0x1], 0  ;;  %s1460_s12 = smov 0   ;;  %s1462_s13 = smov 0  }
   0x5   :  { %s1464_s14 = smov 0   ;;  %s1466_s15 = smov 0  }
   0x6 LB: > { %s1481_s16 = sadd.s32 4294967295, %s1416_s15   ;;  %s1090_s17 = sadd.s32 4294967294, %s1416_s15   ;;  %s1416_s15 = sphi %s1466_s15, %s1751_s15   ;;  %s1412_s14 = sphi %s1464_s14, %s1750_s14   ;;  %s1408_s13 = sphi %s1462_s13, %s1749_s13   ;;  %s1404_s12 = sphi %s1460_s12, %s1748_s12  }
   0x7   : > { %p40_p0 = scmp.ne.s32.totalorder %s1408_s13, %s1404_s12  ;;  %p1732_p1 = scmp.eq.s32.totalorder %s1481_s16, 0 }
   0x8   : > { %p117_p3 = scmp.eq.s32.totalorder %s1090_s17, 1  ;;  %p1091_p5 = scmp.ge.s32.totalorder %s1416_s15, 1 }
   0x9   : > { %p1490_p4 = por %p1732_p1, %p40_p0  ;;  %p124_p7 = scmp.lt.s32.totalorder %s1416_s15, 3 }
   0xa   : > { %p1495_p6 = por %p117_p3, %p40_p0  ;;  %s1418_s21 = smov [#allocation5]  }
   0xb   : > { %s1735_s18 = scalar_select %p1490_p4, 1, 0 }
   0xc   : > { %s1736_s19 = scalar_select %p1495_p6, 1, 0 }
   0xd   : > { %p1500_p8 = pnand %p1091_p5, %p124_p7  ;;  %s136_s22 = sshll.u32 %s1418_s21, 4  ;;  %s1504_s22 = int_to_ptr.vmem [resolvable:$true] %s136_s22 }
   0xe   : > { %s1516_s24 = sadd.s32 1, %s1416_s15   ;;  %s27_s25 = sadd.s32 1, %s1412_s14 }
   0xf   : > { %s1737_s20 = scalar_select %p1500_p8, 1, 0 }
  0x10   : > { %p1204_p9 = pneg %p1500_p8  ;;  %s24_s26 = ssub.s32 %s1416_s15, %s1516_s24 }
  0x11   : > { %s1288_s29 = scalar_lea.hbm %s1730_s2, 512 }
  0x12   : > { %p1511_p11 = pnand %p1204_p9, %p1732_p1  ;;  %p1289_p12 = scmp.ne.s32.totalorder %s1730_s2, %s1288_s29 }
  0x13   : > { %p1295_p5 = scmp.lt.u32.totalorder %s1288_s29, %s1730_s2 }
  0x14   : > { %p1290_p13 = pneg %p1511_p11 }
  0x16   : > { %p1291_p0 = pnand %p1290_p13, %p1289_p12 }
  0x18   : > { %p1292_p3 = pneg %p1291_p0 }
  0x1a   : > { %p1297_p7 = pnand %p1295_p5, %p1292_p3 }
  0x1c   : > { %1300 = shalt.err (!%p1297_p7)
}
  0x1d   : > { %s1301_s7 = scalar_lea.vmem %s1504_s22, 512  ;;  %p1309_p2 = scmp.lt.s32.totalorder %s1504_s22, %s1504_s22 }
  0x1e   : > { %p1302_p9 = scmp.ne.s32.totalorder %s1504_s22, %s1301_s7  ;;  %p1310_p6 = scmp.lt.s32.totalorder %s1301_s7, %s1301_s7 }
  0x20   : > { %p1304_p10 = pnand %p1302_p9, %p1290_p13  ;;  %p1311_p4 = por %p1310_p6, %p1309_p2 }
  0x22   : > { %p1305_p1 = pneg %p1304_p10 }
  0x24   : > { %p1312_p8 = pnand %p1311_p4, %p1305_p1 }
  0x26   : > { %1315 = shalt.err (!%p1312_p8)
}
  0x27   : > { %s1419_s8 = smov 128   ;;  %s1420_s9 = smov 8  }
  0x28   : > { %1207 = dma.hbm_to_vmem [thread:$0]  (!%p1511_p11), %s1730_s2, 512, %s1504_s22, [#allocation6], %s1419_s8, %s1419_s8, %s1420_s9  }
  0x29   : > { %p25_p2 = scmp.eq.s32.totalorder %s24_s26, 0  ;;  %p34_p1 = scmp.ne.s32.totalorder %s1412_s14, %s1408_s13 }
  0x2a   : > { %p35_p4 = scmp.eq.s32.totalorder %s1416_s15, 0  ;;  %p1217_p6 = scmp.lt.s32.totalorder %s1416_s15, 2 }
  0x2b   : > { %s1547_s17 = scalar_select %p25_p2, %s1412_s14, %s27_s25  }
  0x2c   : > { %p36_p8 = por %p35_p4, %p34_p1  ;;  %p1739_p10 = scmp.eq.s32.totalorder %s1481_s16, 1 }
  0x2d   : > { %s150_s27 = sand.u32 1, %s1412_s14   ;;  %s1095_s28 = sshll.u32 %s1416_s15, 7 }
  0x2e   : > { %p1551_p12 = por %p1739_p10, %p34_p1  ;;  %s1094_s29 = sshll.u32 %s150_s27, 3 }
  0x2f   : > { %s1560_s4 = scalar_lea.hbm %s1728_s0, %s1095_s28  ;;  %s154_s22 = scalar_lea.vmem [#allocation2], %s1094_s29 }
  0x30   : > { %s161_s25 = sshll.u32 %s154_s22, 4  ;;  %p1562_p11 = pnand %p1217_p6, %p36_p8  ;;  %s1566_s25 = int_to_ptr.vmem [resolvable:$true] %s161_s25 }
  0x31   : > { %s151_s5 = scalar_lea.sflag [#allocation3], %s150_s27  ;;  %s1316_s6 = scalar_lea.hbm %s1560_s4, 128 }
  0x32   : > { %p1317_p13 = scmp.ne.s32.totalorder %s1560_s4, %s1316_s6  ;;  %p1318_p0 = pneg %p1562_p11 }
  0x33   : > { %s1321_s9 = scalar_lea.hbm %s1728_s0, 256  ;;  %p1322_p7 = scmp.lt.u32.totalorder %s1560_s4, %s1728_s0 }
  0x34   : > { %p1319_p3 = pnand %p1318_p0, %p1317_p13  ;;  %p1323_p9 = scmp.lt.u32.totalorder %s1321_s9, %s1316_s6 }
  0x35   : > { %p1325_p1 = scmp.lt.u32.totalorder %s1316_s6, %s1560_s4 }
  0x36   : > { %p1320_p5 = pneg %p1319_p3  ;;  %p1324_p2 = por %p1323_p9, %p1322_p7 }
  0x38   : > { %p1326_p4 = por %p1325_p1, %p1324_p2 }
  0x3a   : > { %p1327_p6 = pnand %p1326_p4, %p1320_p5 }
  0x3c   : > { %1330 = shalt.err (!%p1327_p6)
}
  0x3d   : > { %s1331_s27 = scalar_lea.vmem %s1566_s25, 128  ;;  %s1421_s28 = smov [#allocation2]  }
  0x3e   : > { %p1332_p8 = scmp.ne.s32.totalorder %s1566_s25, %s1331_s27  ;;  %s1336_s29 = sshll.u32 %s1421_s28, 4  ;;  %s1337_s29 = int_to_ptr.vmem [resolvable:$false] %s1336_s29 }
  0x3f   : > { %s1338_s23 = scalar_lea.vmem %s1337_s29, 256  ;;  %p1339_p3 = scmp.lt.s32.totalorder %s1566_s25, %s1337_s29 }
  0x40   : > { %p1334_p10 = pnand %p1332_p8, %p1318_p0  ;;  %p1340_p7 = scmp.lt.s32.totalorder %s1338_s23, %s1331_s27 }
  0x42   : > { %p1335_p13 = pneg %p1334_p10  ;;  %p1341_p9 = por %p1340_p7, %p1339_p3 }
  0x44   : > { %p1342_p2 = pnand %p1341_p9, %p1335_p13 }
  0x46   : > { %1345 = shalt.err (!%p1342_p2)
}
  0x47   : > { %1211 = dma.hbm_to_vmem [thread:$0]  (!%p1562_p11), %s1560_s4, 128, %s1566_s25, %s151_s5  }
  0x48   : > { %p1742_p5 = scmp.ne.s32.totalorder %s1737_s20, 0 }
  0x49   : > { %s1596_s30 = sand.u32 (!%p1742_p5), 1, %s1408_s13   ;;  %p1743_p0 = scmp.ne.s32.totalorder (!%p1742_p5), %s1735_s18, 0 }
  0x4a   : > { %176 = sbr.rel (%p1742_p5) target bundleno = 1354 (0x54a), region = 32  ;;  %s1097_s22 = sshll.u32 (!%p1742_p5), %s1596_s30, 3 }
  0x4b   : > { %s179_s6 = scalar_lea.sflag (!%p1742_p5), [#allocation3], %s1596_s30  ;;  %s182_s7 = scalar_lea.vmem (!%p1742_p5), [#allocation2], %s1097_s22 }
  0x51   : > { %1391 = dma.done.wait (%p1743_p0), %s179_s6, 128  }
  0x52   : > { %1393 = vsyncadd (%p1743_p0), %s179_s6, 4294967168  ;;  %p1744_p11 = scmp.eq.s32.totalorder %s1481_s16, 0 }
  0x54   : > { %1395 = dma.done.wait (%p1744_p11), [#allocation6], 512   ;;  %p1745_p1 = pmov %p1744_p11 }
  0x55   : > { %v1422_v0 = vmov 0.0|0.0   ;;  %vm1423_vm0 = vmmov 0   ;;  %v1424_v1 = vmov 0.0   ;;  %v216_v2 = vld [vmem:[#allocation5] sm:$0xff]  ;;  %v217_v3 = vld [vmem:[#allocation5 + $0x8] sm:$0xff]  ;;  %v218_v4 = vld [vmem:[#allocation5 + $0x10] sm:$0xff] }
  0x56   : > { %1397 = vsyncadd (%p1745_p1), [#allocation6], 4294966784  ;;  %1190 = vmatprep.subr.bf16.mxu0 %v1422_v0  ;;  %1147 = vmatprep.mubr.msk.f32.mxu0 %vm1423_vm0, %v1424_v1  ;;  %v1191_v5 = vpack.c.bf16 %v217_v3, %v216_v2  ;;  %v219_v6 = vld [vmem:[#allocation5 + $0x18] sm:$0xff]  ;;  %vm220_vm1 = vcmask 261120   ;;  %s1425_s18 = smov 120   ;;  %s1426_s20 = smov 96  }
  0x57   : > { %1150 = vmatprep.subr.mxu1 %v1424_v1  ;;  %1152 = vmatprep.mubr.msk.f32.mxu1 %vm1423_vm0, %v1424_v1  ;;  %v1194_v7 = vpack.c.bf16 %v219_v6, %v218_v4  ;;  %v215_v8 = vld [vmem:[%s182_s7] sm:$0xff]  ;;  %s1427_s4 = smov 80   ;;  %s1428_s25 = smov 88   ;;  %vm298_vm2 = vcmask 64512   ;;  %vm982_vm3 = vcmask 130048   ;;  %vm984_vm4 = vcmask 195584  }
  0x58   : > { %1192 = vmatpush3.bf16.msra.mxu0 %v1191_v5  ;;  %s1429_s26 = smov 72   ;;  %s1430_s5 = smov 112  }
  0x59   : > { %1193 = vmatprep.subr.bf16.mxu0 %v1422_v0  ;;  %s1431_s8 = smov 104   ;;  %p212_p4 = scmp.lt.s32.totalorder %s1481_s16, 1 }
  0x5a   : > { %s1432_s28 = smov 56   ;;  %s1433_s29 = smov 64  }
  0x5b   : > { %s213_s9 = scalar_select %p212_p4, %s1481_s16, 1 }
  0x5c   : > { %1195 = vmatpush3.bf16.msra.mxu0 %v1194_v7  ;;  %s1434_s23 = smov 48   ;;  %s1435_s6 = smov 40  }
  0x5d   : > { %1160 = vmatprep.subr.mxu0 %v1424_v1  ;;  %s214_s27 = scalar_lea.vmem %s1729_s1, %s213_s9  ;;  %s1436_s7 = smov 8  }
  0x5e   : > { %v1103_v19 = vld [vmem:[%s214_s27] ss:$0 sm:$0xff]  ;;  %s1439_s10 = smov [#allocation7]  }
  0x5f   : > { %1148 = vmatmul.mubr.msk.f32.vlgmr.msra.gmra.mrb[0].mxu0 %vm220_vm1, %v215_v8  ;;  %s1350_s11 = sshll.u32 %s1439_s10, 4  ;;  %s1351_s11 = int_to_ptr.vmem [resolvable:$false] %s1350_s11 }
  0x60   : > { %1162 = vmatprep.mubr.msk.f32.mxu0 %vm1423_vm0, %v1424_v1  ;;  %s1352_s27 = scalar_lea.vmem %s1351_s11, 256 }
 0x132   : > { %v1619_v9 = vpop.f32.mrb[0].mxu0 }
 0x133   : > { %468 = vrot.lane.b32.xlu1 %v1619_v9, %s1425_s18  ;;  %296 = vrot.lane.b32.xlu0 %v1619_v9, %s1426_s20  ;;  %v1149_v10 = vpop.f32.mrb[1].mxu0  ;;  %s1437_s18 = smov 16   ;;  %s1438_s20 = smov 24  }
 0x137   : > { %637 = vrot.lane.b32.xlu1 %v1619_v9, %s1427_s4  ;;  %470 = vrot.lane.b32.xlu0 %v1619_v9, %s1428_s25  ;;  %s1115_s4 = sshll.u32 %s1481_s16, 7  ;;  %s211_s25 = scalar_lea.vmem [#allocation7], %s1097_s22 }
 0x138   : > { %s1683_s9 = scalar_lea.hbm %s1731_s3, %s1115_s4  ;;  %s988_s16 = scalar_lea.sflag [#allocation4], %s1596_s30 }
 0x13b   : > { %804 = vrot.lane.b32.xlu1 %v1619_v9, %s1429_s26  ;;  %635 = vrot.lane.b32.xlu0 %v1619_v9, %s1430_s5  ;;  %s1001_s26 = sshll.u32 %s211_s25, 4  ;;  %s1685_s26 = int_to_ptr.vmem [resolvable:$true] %s1001_s26 }
 0x13c   : > { %s1346_s22 = scalar_lea.vmem %s1685_s26, 128  ;;  %p1353_p13 = scmp.lt.s32.totalorder %s1685_s26, %s1351_s11 }
 0x13d   : > { %p1347_p6 = scmp.ne.s32.totalorder %s1685_s26, %s1346_s22  ;;  %p1354_p3 = scmp.lt.s32.totalorder %s1352_s27, %s1346_s22 }
 0x13f   : > { %802 = vrot.lane.b32.xlu0 %v1619_v9, %s1431_s8  ;;  %p1348_p8 = pnand %p1347_p6, %p1551_p12  ;;  %p1355_p7 = por %p1354_p3, %p1353_p13 }
 0x141   : > { %p1349_p10 = pneg %p1348_p8 }
 0x143   : > { %p1356_p9 = pnand %p1355_p7, %p1349_p10 }
 0x1a5   : > { %v469_v11 = vpop.permute.xlu1 %468  ;;  %v297_v12 = vpop.permute.xlu0 %296 }
 0x1a6   : > { %1151 = vmatpush3.xpose.msk.msra.mxu1 %vm298_vm2, %v297_v12 }
 0x1a7   : > { %1155 = vmatprep.subr.mxu1 %v1424_v1 }
 0x1a9   : > { %1153 = vmatmul.mubr.msk.f32.vlgmr.msra.gmra.mrb[0].mxu1 %vm298_vm2, %v1619_v9  ;;  %v471_v13 = vpop.permute.xlu0 %470  ;;  %v638_v14 = vpop.permute.xlu1 %637 }
 0x1aa   : > { %1161 = vmatpush3.xpose.msk.msra.mxu0 %vm298_vm2, %v471_v13  ;;  %1157 = vmatprep.mubr.msk.f32.mxu1 %vm1423_vm0, %v1424_v1 }
 0x1ab   : > { %1170 = vmatprep.subr.mxu0 %v1424_v1 }
 0x1ad   : > { %1163 = vmatmul.mubr.msk.f32.vlgmr.msra.gmra.mrb[2].mxu0 %vm298_vm2, %v469_v11  ;;  %v636_v15 = vpop.permute.xlu0 %635  ;;  %v805_v16 = vpop.permute.xlu1 %804 }
 0x1ae   : > { %1171 = vmatpush3.xpose.msk.msra.mxu0 %vm298_vm2, %v638_v14  ;;  %1172 = vmatprep.mubr.msk.f32.mxu0 %vm1423_vm0, %v1424_v1 }
 0x1af   : > { %1180 = vmatprep.subr.mxu0 %v1424_v1 }
 0x1b1   : > { %1173 = vmatmul.mubr.msk.f32.vlgmr.msra.gmra.mrb[4].mxu0 %vm298_vm2, %v636_v15  ;;  %v803_v17 = vpop.permute.xlu0 %802 }
 0x1b2   : > { %1181 = vmatpush3.xpose.msk.msra.mxu0 %vm298_vm2, %v805_v16  ;;  %1182 = vmatprep.mubr.msk.f32.mxu0 %vm1423_vm0, %v1424_v1 }
 0x1b5   : > { %1183 = vmatmul.mubr.msk.f32.vlgmr.msra.gmra.mrb[6].mxu0 %vm298_vm2, %v803_v17 }
 0x27c   : > { %v369_v18 = vpop.f32.mrb[0].mxu1 }
 0x27d   : > { %v373_v20 = vmul.f32 0.17677669, %v369_v18  ;;  %v1154_v21 = vpop.f32.mrb[1].mxu1 }
 0x27f   : > { %v380_v22 = vadd.f32 %v1103_v19, %v373_v20 }
 0x280   : > { %v542_v23 = vpop.f32.mrb[2].mxu0 }
 0x281   : > { %v546_v24 = vmul.f32 0.17677669, %v542_v23  ;;  %v1164_v25 = vpop.f32.mrb[3].mxu0  ;;  %v381_v26 = vsel %vm298_vm2, %v380_v22, -inf }
 0x282   : > { %382 = vmax.xlane.f32.xlu1 %v381_v26 }
 0x283   : > { %v547_v27 = vadd.f32 %v1103_v19, %v546_v24 }
 0x284   : > { %v709_v28 = vpop.f32.mrb[4].mxu0 }
 0x285   : > { %v713_v29 = vmul.f32 0.17677669, %v709_v28  ;;  %v1174_v30 = vpop.f32.mrb[5].mxu0  ;;  %v548_v31 = vsel %vm298_vm2, %v547_v27, -inf }
 0x286   : > { %549 = vmax.xlane.f32.xlu0 %v548_v31 }
 0x287   : > { %v714_v32 = vadd.f32 %v1103_v19, %v713_v29 }
 0x288   : > { %v876_v33 = vpop.f32.mrb[6].mxu0 }
 0x289   : > { %v880_v34 = vmul.f32 0.17677669, %v876_v33  ;;  %v1184_v35 = vpop.f32.mrb[7].mxu0  ;;  %v715_v36 = vsel %vm298_vm2, %v714_v32, -inf }
 0x28a   : > { %716 = vmax.xlane.f32.xlu0 %v715_v36 }
 0x28b   : > { %v881_v37 = vadd.f32 %v1103_v19, %v880_v34 }
 0x28d   : > { %v882_v38 = vsel %vm298_vm2, %v881_v37, -inf }
 0x28e   : > { %883 = vmax.xlane.f32.xlu1 %v882_v38 }
 0x29f   : > { %559 = vrot.lane.b32.xlu1 %v1619_v9, %s1432_s28 }
 0x30f   : > { %v383_v39 = vpop.xlane.xlu1 %382 }
 0x310   : > { %v384_v40 = vsub.f32 %v380_v22, %v383_v39 }
 0x312   : > { %v385_v41 = vmul.f32 1.442695, %v384_v40 }
 0x313   : > { %v550_v42 = vpop.xlane.xlu0 %549 }
 0x314   : > { %1272 = vpow2.f32 %v385_v41  ;;  %v551_v43 = vsub.f32 %v547_v27, %v550_v42 }
 0x316   : > { %v552_v44 = vmul.f32 1.442695, %v551_v43 }
 0x317   : > { %v717_v54 = vpop.xlane.xlu0 %716 }
 0x318   : > { %1274 = vpow2.f32 %v552_v44  ;;  %v718_v55 = vsub.f32 %v714_v32, %v717_v54 }
 0x31a   : > { %v719_v56 = vmul.f32 1.442695, %v718_v55 }
 0x31b   : > { %v884_v45 = vpop.xlane.xlu1 %883 }
 0x31c   : > { %v885_v46 = vsub.f32 %v881_v37, %v884_v45 }
 0x31e   : > { %v1273_v47 = vpop.eup %1272  ;;  %v886_v48 = vmul.f32 1.442695, %v885_v46 }
 0x31f   : > { %v387_v49 = vsel %vm298_vm2, %v1273_v47, 0.0  ;;  %v560_v59 = vpop.permute.xlu1 %559 }
 0x320   : > { %1276 = vpow2.f32 %v886_v48  ;;  %388 = vadd.xlane.f32.xlu0 %v387_v49 }
 0x321   : > { %1278 = vpow2.f32 %v719_v56 }
 0x322   : > { %v1275_v50 = vpop.eup %1274 }
 0x323   : > { %v554_v51 = vsel %vm298_vm2, %v1275_v50, 0.0 }
 0x324   : > { %555 = vadd.xlane.f32.xlu1 %v554_v51 }
 0x32a   : > { %v1277_v52 = vpop.eup %1276 }
 0x32b   : > { %v888_v53 = vsel %vm298_vm2, %v1277_v52, 0.0  ;;  %v1279_v57 = vpop.eup %1278 }
 0x32c   : > { %889 = vadd.xlane.f32.xlu1 %v888_v53  ;;  %v721_v58 = vsel %vm298_vm2, %v1279_v57, 0.0 }
 0x336   : > { %392 = vrot.lane.b32.xlu0 %v1619_v9, %s1433_s29 }
 0x33d   : > { %726 = vrot.lane.b32.xlu1 %v1619_v9, %s1434_s23 }
 0x355   : > { %722 = vadd.xlane.f32.xlu0 %v721_v58 }
 0x36b   : > { %893 = vrot.lane.b32.xlu0 %v1619_v9, %s1435_s6 }
 0x3ad   : > { %v389_v60 = vpop.xlane.xlu0 %388 }
 0x3ae   : > { %1280 = vrcp.f32 %v389_v60 }
 0x3b1   : > { %v393_v61 = vpop.permute.xlu0 %392  ;;  %v556_v62 = vpop.xlane.xlu1 %555 }
 0x3b2   : > { %1282 = vrcp.f32 %v556_v62  ;;  %1156 = vmatpush3.msra.mxu1 %v393_v61 }
 0x3b3   : > { %1165 = vmatprep.subr.mxu1 %v1424_v1 }
 0x3b8   : > { %v1281_v63 = vpop.eup %1280 }
 0x3b9   : > { %v391_v0 = vmul.f32 %v1281_v63, %v1273_v47  ;;  %v890_v2 = vpop.xlane.xlu1 %889 }
 0x3bb   : > { %1158 = vmatmul.mubr.msk.f32.vlgmr.msra.gmra.mrb[2].mxu1 %vm298_vm2, %v391_v0 }
 0x3bc   : > { %v1283_v3 = vpop.eup %1282  ;;  %1166 = vmatpush3.msra.mxu1 %v560_v59  ;;  %1167 = vmatprep.mubr.msk.f32.mxu1 %vm1423_vm0, %v1424_v1 }
 0x3bd   : > { %v558_v4 = vmul.f32 %v1283_v3, %v1275_v50  ;;  %v727_v5 = vpop.permute.xlu1 %726  ;;  %1175 = vmatprep.subr.mxu1 %v1424_v1 }
 0x3bf   : > { %1168 = vmatmul.mubr.msk.f32.vlgmr.msra.gmra.mrb[4].mxu1 %vm298_vm2, %v558_v4 }
 0x3c0   : > { %1176 = vmatpush3.msra.mxu1 %v727_v5  ;;  %1177 = vmatprep.mubr.msk.f32.mxu1 %vm1423_vm0, %v1424_v1 }
 0x3c1   : > { %1185 = vmatprep.subr.mxu1 %v1424_v1 }
 0x3e2   : > { %v723_v6 = vpop.xlane.xlu0 %722 }
 0x3e3   : > { %1284 = vrcp.f32 %v723_v6 }
 0x3e4   : > { %1286 = vrcp.f32 %v890_v2 }
 0x3e6   : > { %v894_v10 = vpop.permute.xlu0 %893 }
 0x3ed   : > { %v1285_v7 = vpop.eup %1284 }
 0x3ee   : > { %v725_v8 = vmul.f32 %v1285_v7, %v1279_v57  ;;  %v1287_v9 = vpop.eup %1286 }
 0x3ef   : > { %v892_v11 = vmul.f32 %v1287_v9, %v1277_v52 }
 0x3f0   : > { %1178 = vmatmul.mubr.msk.f32.vlgmr.msra.gmra.mrb[6].mxu1 %vm298_vm2, %v725_v8 }
 0x3f1   : > { %1186 = vmatpush3.msra.mxu1 %v894_v10  ;;  %1187 = vmatprep.mubr.msk.f32.mxu1 %vm1423_vm0, %v1424_v1 }
 0x3f4   : > { %1188 = vmatmul.mubr.msk.f32.vlgmr.msra.gmra.mrb[8].mxu1 %vm298_vm2, %v892_v11 }
 0x48e   : > { %v464_v12 = vpop.f32.mrb[2].mxu1 }
 0x48f   : > { %v1159_v13 = vpop.f32.mrb[3].mxu1 }
 0x492   : > { %v631_v14 = vpop.f32.mrb[4].mxu1 }
 0x493   : > { %970 = vrot.lane.b32.xlu1 %v631_v14, %s1436_s7  ;;  %v1169_v15 = vpop.f32.mrb[5].mxu1 }
 0x4c3   : > { %v798_v16 = vpop.f32.mrb[6].mxu1 }
 0x4c4   : > { %974 = vrot.lane.b32.xlu0 %v798_v16, %s1437_s18  ;;  %v1179_v17 = vpop.f32.mrb[7].mxu1 }
 0x4c7   : > { %v965_v18 = vpop.f32.mrb[8].mxu1 }
 0x4c8   : > { %978 = vrot.lane.b32.xlu1 %v965_v18, %s1438_s20  ;;  %v1189_v1 = vpop.f32.mrb[9].mxu1 }
 0x505   : > { %v971_v19 = vpop.permute.xlu1 %970 }
 0x506   : > { %v981_v21 = vsel %vm298_vm2, %v464_v12, %v971_v19 }
 0x536   : > { %v975_v20 = vpop.permute.xlu0 %974 }
 0x537   : > { %v983_v22 = vsel %vm982_vm3, %v981_v21, %v975_v20 }
 0x53a   : > { %v979_v23 = vpop.permute.xlu1 %978 }
 0x53b   : > { %v985_v24 = vsel %vm984_vm4, %v983_v22, %v979_v23 }
 0x53c   : > { %986 = vst.msk [vmem:[%s211_s25] sm:$0xff] %vm220_vm1, %v985_v24 }
 0x53d   : > { %1359 = shalt.err (!%p1356_p9)
}
 0x53e   : > { %s1360_s30 = scalar_lea.hbm %s1683_s9, 128  ;;  %s1364_s23 = scalar_lea.hbm %s1731_s3, 256 }
 0x53f   : > { %p1361_p2 = scmp.ne.s32.totalorder %s1683_s9, %s1360_s30  ;;  %p1365_p11 = scmp.lt.u32.totalorder %s1683_s9, %s1731_s3 }
 0x540   : > { %p1366_p1 = scmp.lt.u32.totalorder %s1364_s23, %s1360_s30  ;;  %p1368_p6 = scmp.lt.u32.totalorder %s1360_s30, %s1683_s9 }
 0x541   : > { %p1362_p5 = pnand %p1361_p2, %p1551_p12 }
 0x542   : > { %p1367_p4 = por %p1366_p1, %p1365_p11 }
 0x543   : > { %p1363_p0 = pneg %p1362_p5 }
 0x544   : > { %p1369_p8 = por %p1368_p6, %p1367_p4 }
 0x546   : > { %p1370_p10 = pnand %p1369_p8, %p1363_p0 }
 0x548   : > { %1373 = shalt.err (!%p1370_p10)
}
 0x549   : > { %1202 = dma.vmem_to_hbm [thread:$0]  (%p1551_p12), %s1685_s26, 128, %s1683_s9, %s988_s16  }
 0x54a PF: > { %s1013_s18 = sand.u32 1, %s1404_s12   ;;  %p1746_p13 = scmp.ne.s32.totalorder %s1736_s19, 0 }
 0x54b   : > { %p1747_p3 = scmp.ge.s32.totalorder %s1416_s15, 2  ;;  %s1014_s20 = scalar_lea.sflag [#allocation4], %s1013_s18 }
 0x54d   : > { %p1213_p7 = pnand %p1747_p3, %p1746_p13 }
 0x54f   : > { %1399 = dma.done.wait (!%p1213_p7), %s1014_s20, 128  }
 0x550   : > { %1401 = vsyncadd (!%p1213_p7), %s1014_s20, 4294967168  ;;  %p17_p9 = scmp.ge.s32.totalorder %s1516_s24, 4   ;;  %s1748_s12 = smov %s1408_s13 }
 0x551   : > { %s1749_s13 = smov %s1412_s14  ;;  %s1750_s14 = smov %s1547_s17 }
 0x552   : > { %s1751_s15 = smov %s1516_s24  ;;  %19 = sbr.rel (!%p17_p9) target bundleno = 6 (0x6), region = 84 }
 0x559   :  { %1019 = vsyncpa [#allocation3], 1 }
 0x55a   :  { %1021 = vsyncpa [#allocation3 + $0x1], 1 }
 0x55b   :  { %1022 = vsyncpa [#allocation6], 1 }
 0x55c   :  { %1023 = vsyncpa [#allocation4], 1 }
 0x55d   :  { %1025 = vsyncpa [#allocation4 + $0x1], 1 }

</bundles_post_ra>
